<compile_context>
chip_gen: v7x
topology: tpu7x:2x2x1
jax: 0.10.0
libtpu: 0.0.40
codegen_flags: <defaults>
</compile_context>

<pallas_src>
import jax
import jax.numpy as jnp
from jax.experimental import pallas as pl
from jax.experimental.pallas import tpu as pltpu

BN_EPS = 1e-5

# ~4 MiB of input (left+right, bf16) per grid step: big enough to amortize the
# per-step pipeline overhead on v5e..v7x, small enough that the double-buffered
# blocks + in-kernel f32 intermediates stay well inside every chip's VMEM.
_STEP_INPUT_BYTES = 4 << 20
# Below this many rows a single grid step is fine; above it (and when the whole
# batch still fits in one step) split into two tiles so v7x's two TensorCores
# both get work on the "parallel" batch axis.
_MIN_SPLIT_ROWS = 2048


# --------------------------------------------------------------------------- #
# Kernel
# --------------------------------------------------------------------------- #
def context_mlp_kernel(
    slopes_ref,                 # SMEM (3,)  f32   per-layer PReLU slopes
    left_ref, right_ref,        # VMEM (TB, F) bf16 batch tiles of the two inputs
    w1a_ref, w1b_ref, b1_ref,   # layer1, W1 split into left/right halves
    w2_ref, b2_ref,             # layer2 with BN1 folded in
    w3_ref, b3_ref,             # layer3 with BN2 folded in
    w4_ref, b4_ref,             # fused [left|right] head with BN3 folded in
    out_ref,                    # VMEM (TB, 2) f32
):
    bf16 = jnp.bfloat16
    f32 = jnp.float32

    def prelu(h, slope):
        # f32 element-wise (v5e VPU has no bf16 ALU); filler under the DMA.
        return jnp.where(h >= 0.0, h, slope * h)

    # Layer 1 (concat avoided by splitting W1); inputs are already bf16.
    h = (jnp.dot(left_ref[...], w1a_ref[...], preferred_element_type=f32)
         + jnp.dot(right_ref[...], w1b_ref[...], preferred_element_type=f32)
         + b1_ref[...])
    h = prelu(h, slopes_ref[0])

    # Layer 2 (BN1 folded into W2/b2)
    h = jnp.dot(h.astype(bf16), w2_ref[...], preferred_element_type=f32) + b2_ref[...]
    h = prelu(h, slopes_ref[1])

    # Layer 3 (BN2 folded into W3/b3)
    h = jnp.dot(h.astype(bf16), w3_ref[...], preferred_element_type=f32) + b3_ref[...]
    h = prelu(h, slopes_ref[2])

    # Fused left/right head (BN3 folded into W4/b4) -> single narrow [TB, 2]
    # store (intentionally NOT padded to 128 lanes: that would add 512 B/row of
    # HBM traffic to save an 8 B/row masked store).
    out_ref[...] = (jnp.dot(h.astype(bf16), w4_ref[...], preferred_element_type=f32)
                    + b4_ref[...])


# --------------------------------------------------------------------------- #
# Parameter construction (PyTorch-like shapes) and wrapper-side folding
# --------------------------------------------------------------------------- #
def init_params(key, in_size):
    """Parameters mirroring the PyTorch module (Linear weights pre-transposed
    to [in, out]).  BN running stats / affine params are randomized so the
    folding math is actually exercised."""
    def linear(key, fan_in, fan_out):
        kw, kb = jax.random.split(key)
        bound = 1.0 / jnp.sqrt(jnp.float32(fan_in))
        w = jax.random.uniform(kw, (fan_in, fan_out), jnp.float32, -bound, bound)
        b = jax.random.uniform(kb, (1, fan_out), jnp.float32, -bound, bound)
        return w, b

    def bn(key, fout):
        kg, kb, km, kv = jax.random.split(key, 4)
        g = jax.random.uniform(kg, (1, fout), jnp.float32, 0.8, 1.2)
        be = 0.1 * jax.random.normal(kb, (1, fout), jnp.float32)
        m = 0.1 * jax.random.normal(km, (1, fout), jnp.float32)
        v = jax.random.uniform(kv, (1, fout), jnp.float32, 0.8, 1.2)
        return g, be, m, v

    keys = jax.random.split(key, 8)
    w1, b1 = linear(keys[0], in_size * 2, in_size)
    w2, b2 = linear(keys[1], in_size, in_size)
    w3, b3 = linear(keys[2], in_size, in_size // 2)
    w4l, b4l = linear(keys[3], in_size // 2, 1)
    w4r, b4r = linear(keys[4], in_size // 2, 1)
    g1, be1, m1, v1 = bn(keys[5], in_size)
    g2, be2, m2, v2 = bn(keys[6], in_size)
    g3, be3, m3, v3 = bn(keys[7], in_size // 2)

    # Three independent PReLU slopes (one per nn.PReLU()).
    a1 = jnp.full((1, 1), 0.25, jnp.float32)
    a2 = jnp.full((1, 1), 0.10, jnp.float32)
    a3 = jnp.full((1, 1), 0.30, jnp.float32)

    return (w1, b1, a1, g1, be1, m1, v1,
            w2, b2, a2, g2, be2, m2, v2,
            w3, b3, a3, g3, be3, m3, v3,
            w4l, b4l, w4r, b4r)


def fold_params(params):
    """Fold each eval-mode BN (which sits AFTER PReLU) forward into the next
    Linear; fuse the two heads; split W1; cast MXU operands to bf16."""
    (w1, b1, a1, g1, be1, m1, v1,
     w2, b2, a2, g2, be2, m2, v2,
     w3, b3, a3, g3, be3, m3, v3,
     w4l, b4l, w4r, b4r) = params

    in_size = w2.shape[0]

    def bn_affine(g, be, m, v):
        s = g * jax.lax.rsqrt(v + BN_EPS)     # [1, F]
        t = be - m * s                        # [1, F]
        return s, t

    s1, t1 = bn_affine(g1, be1, m1, v1)
    s2, t2 = bn_affine(g2, be2, m2, v2)
    s3, t3 = bn_affine(g3, be3, m3, v3)

    # Fused two-column head.
    w4 = jnp.concatenate([w4l, w4r], axis=1)  # [in//2, 2]
    b4 = jnp.concatenate([b4l, b4r], axis=1)  # [1, 2]

    # (s*h + t) @ W + b  ==  h @ (diag(s) W) + (t @ W + b)
    w2f, b2f = s1.T * w2, t1 @ w2 + b2
    w3f, b3f = s2.T * w3, t2 @ w3 + b3
    w4f, b4f = s3.T * w4, t3 @ w4 + b4

    w1a, w1b = w1[:in_size], w1[in_size:]

    slopes = jnp.stack([a1.reshape(()), a2.reshape(()), a3.reshape(())]
                       ).astype(jnp.float32)  # (3,) -> SMEM

    bf16, f32 = jnp.bfloat16, jnp.float32
    return (slopes,
            w1a.astype(bf16), w1b.astype(bf16), b1.astype(f32),
            w2f.astype(bf16), b2f.astype(f32),
            w3f.astype(bf16), b3f.astype(f32),
            w4f.astype(bf16), b4f.astype(f32))


# --------------------------------------------------------------------------- #
# pallas_call wrapper
# --------------------------------------------------------------------------- #
def _round_up(x, m):
    return (x + m - 1) // m * m


def _choose_tile_b(batch, in_size):
    """Batch tile sized by bytes per grid step (fixed cap per in_size)."""
    rounded = _round_up(max(batch, 1), 8)
    bytes_per_row = 2 * in_size * 2                      # two bf16 inputs per row
    cap = max(8, (_STEP_INPUT_BYTES // bytes_per_row) // 8 * 8)
    if rounded > cap:
        return cap
    if rounded >= _MIN_SPLIT_ROWS:
        # Whole batch fits in one step: use two tiles so both v7x TCs get work.
        return _round_up((rounded + 1) // 2, 8)
    return rounded


@jax.jit
def context_mlp_forward(left_in, right_in, slopes,
                        w1a, w1b, b1, w2, b2, w3, b3, w4, b4):
    batch, in_size = left_in.shape

    # Feed the kernel bf16 inputs (it uses them as bf16 MXU operands anyway):
    # halves input HBM traffic and per-tile VMEM vs. the old f32 upcast.
    left = left_in.astype(jnp.bfloat16)
    right = right_in.astype(jnp.bfloat16)

    tile_b = _choose_tile_b(batch, in_size)
    padded = _round_up(max(batch, 1), tile_b)
    if padded != batch:
        pad = ((0, padded - batch), (0, 0))
        left = jnp.pad(left, pad)
        right = jnp.pad(right, pad)

    grid = (padded // tile_b,)

    # Scoped-VMEM limit from the actual footprint (double-buffered input/output
    # blocks + VMEM-resident weights + in-kernel f32 intermediates) + headroom.
    weight_bytes = sum(a.size * a.dtype.itemsize
                       for a in (w1a, w1b, b1, w2, b2, w3, b3, w4, b4))
    block_bytes = (2 * (2 * tile_b * in_size * 2)        # 2 bf16 inputs, 2 buffers
                   + 2 * (tile_b * 2 * 4))               # f32 output, 2 buffers
    interm_bytes = 6 * tile_b * in_size * 4              # live f32 intermediates bound
    vmem_limit = int(1.25 * (block_bytes + interm_bytes + 2 * weight_bytes)) + (2 << 20)
    vmem_limit = max(16 << 20, min(56 << 20, vmem_limit))

    def resident(arr):
        # Whole-array block with a constant index map -> VMEM-resident weight.
        # (At in_size=32 default double-buffering of these is negligible; for
        #  in_size >= ~1024 switch to pipeline_mode=pl.Buffered(1).)
        return pl.BlockSpec(arr.shape, lambda i: (0, 0))

    batch_spec = pl.BlockSpec((tile_b, in_size), lambda i: (i, 0))

    out = pl.pallas_call(
        context_mlp_kernel,
        out_shape=jax.ShapeDtypeStruct((padded, 2), jnp.float32),
        grid=grid,
        in_specs=[
            pl.BlockSpec(memory_space=pltpu.MemorySpace.SMEM),   # PReLU slopes
            batch_spec, batch_spec,                              # left, right (bf16)
            resident(w1a), resident(w1b), resident(b1),
            resident(w2), resident(b2),
            resident(w3), resident(b3),
            resident(w4), resident(b4),
        ],
        out_specs=pl.BlockSpec((tile_b, 2), lambda i: (i, 0)),
        compiler_params=pltpu.CompilerParams(
            dimension_semantics=("parallel",),                   # shard batch on 2 TCs
            vmem_limit_bytes=vmem_limit),
    )(slopes, left, right, w1a, w1b, b1, w2, b2, w3, b3, w4, b4)

    out = out[:batch]
    return out[:, 0:1], out[:, 1:2]


# --------------------------------------------------------------------------- #
# Pure-JAX f32 reference of the ORIGINAL (unfolded) module, eval mode.
# --------------------------------------------------------------------------- #
def _reference(left_in, right_in, params):
    (w1, b1, a1, g1, be1, m1, v1,
     w2, b2, a2, g2, be2, m2, v2,
     w3, b3, a3, g3, be3, m3, v3,
     w4l, b4l, w4r, b4r) = params

    def block(x, w, b, a, g, be, m, v):
        h = x @ w + b
        h = jnp.where(h >= 0, h, a.reshape(()) * h)
        return g * (h - m) / jnp.sqrt(v + BN_EPS) + be   # Dropout(eval)=id

    x = jnp.concatenate([left_in, right_in], axis=1)
    h = block(x, w1, b1, a1, g1, be1, m1, v1)
    h = block(h, w2, b2, a2, g2, be2, m2, v2)
    h = block(h, w3, b3, a3, g3, be3, m3, v3)
    return h @ w4l + b4l, h @ w4r + b4r


if __name__ == "__main__":
    in_size = 32
    key = jax.random.PRNGKey(0)
    k_left, k_right, k_params = jax.random.split(key, 3)

    params = init_params(k_params, in_size)
    folded = fold_params(params)

    # Two batch sizes: a tiny one (single small tile) and a larger, non-multiple
    # of-8 one that exercises padding + the 2-tile megacore split path.
    for batch in (8, 2051):
        left_in = jax.random.normal(k_left, (batch, in_size), jnp.float32)
        right_in = jax.random.normal(k_right, (batch, in_size), jnp.float32)

        left_out, right_out = context_mlp_forward(left_in, right_in, *folded)
        jax.block_until_ready((left_out, right_out))

        ref_l, ref_r = _reference(left_in, right_in, params)
        assert left_out.shape == (batch, 1) and right_out.shape == (batch, 1)
        # Tolerance covers bf16 rounding of MXU operands (inputs/activations);
        # the folding math itself is exact.
        assert jnp.allclose(left_out, ref_l, atol=5e-2, rtol=5e-2), \
            float(jnp.max(jnp.abs(left_out - ref_l)))
        assert jnp.allclose(right_out, ref_r, atol=5e-2, rtol=5e-2), \
            float(jnp.max(jnp.abs(right_out - ref_r)))

    print("KERNEL_OK")
</pallas_src>

<mosaic_0001>
module attributes {stable_mosaic.version = 11 : i64} {
  func.func @context_mlp_kernel(%arg0: i32, %arg1: memref<3xf32, #tpu.memory_space<smem>>, %arg2: memref<8x32xbf16, #tpu.memory_space<vmem>>, %arg3: memref<8x32xbf16, #tpu.memory_space<vmem>>, %arg4: memref<32x32xbf16, #tpu.memory_space<vmem>>, %arg5: memref<32x32xbf16, #tpu.memory_space<vmem>>, %arg6: memref<1x32xf32, #tpu.memory_space<vmem>>, %arg7: memref<32x32xbf16, #tpu.memory_space<vmem>>, %arg8: memref<1x32xf32, #tpu.memory_space<vmem>>, %arg9: memref<32x16xbf16, #tpu.memory_space<vmem>>, %arg10: memref<1x16xf32, #tpu.memory_space<vmem>>, %arg11: memref<16x2xbf16, #tpu.memory_space<vmem>>, %arg12: memref<1x2xf32, #tpu.memory_space<vmem>>, %arg13: memref<8x2xf32, #tpu.memory_space<vmem>>) attributes {dimension_semantics = [#tpu.dimension_semantics<parallel>], iteration_bounds = array<i64: 1>, scalar_prefetch = 0 : i64, scratch_operands = 0 : i64, tpu.core_type = #tpu.core_type<tc>, window_params = [{transform_indices = @transform_0, window_bounds = array<i64: 3>}, {transform_indices = @transform_1, window_bounds = array<i64: 8, 32>}, {transform_indices = @transform_2, window_bounds = array<i64: 8, 32>}, {pipeline_mode = #tpu.pipeline_mode<synchronous>, transform_indices = @transform_3, window_bounds = array<i64: 32, 32>}, {pipeline_mode = #tpu.pipeline_mode<synchronous>, transform_indices = @transform_4, window_bounds = array<i64: 32, 32>}, {pipeline_mode = #tpu.pipeline_mode<synchronous>, transform_indices = @transform_5, window_bounds = array<i64: 1, 32>}, {pipeline_mode = #tpu.pipeline_mode<synchronous>, transform_indices = @transform_6, window_bounds = array<i64: 32, 32>}, {pipeline_mode = #tpu.pipeline_mode<synchronous>, transform_indices = @transform_7, window_bounds = array<i64: 1, 32>}, {pipeline_mode = #tpu.pipeline_mode<synchronous>, transform_indices = @transform_8, window_bounds = array<i64: 32, 16>}, {pipeline_mode = #tpu.pipeline_mode<synchronous>, transform_indices = @transform_9, window_bounds = array<i64: 1, 16>}, {pipeline_mode = #tpu.pipeline_mode<synchronous>, transform_indices = @transform_10, window_bounds = array<i64: 16, 2>}, {pipeline_mode = #tpu.pipeline_mode<synchronous>, transform_indices = @transform_11, window_bounds = array<i64: 1, 2>}, {transform_indices = @transform_12, window_bounds = array<i64: 8, 2>}]} {
    %c0 = arith.constant 0 : index
    %c0_0 = arith.constant 0 : index
    %0 = vector.load %arg2[%c0, %c0_0] : memref<8x32xbf16, #tpu.memory_space<vmem>>, vector<8x32xbf16>
    %c0_1 = arith.constant 0 : index
    %c0_2 = arith.constant 0 : index
    %1 = vector.load %arg4[%c0_1, %c0_2] : memref<32x32xbf16, #tpu.memory_space<vmem>>, vector<32x32xbf16>
    %cst = arith.constant dense<0.000000e+00> : vector<8x32xf32>
    %2 = tpu.matmul %0, %1, %cst {dimension_numbers = #tpu.dot_dimension_numbers<[1], [0], [0], [1], [0, 0, 1, 1], [], []>} : vector<8x32xbf16>, vector<32x32xbf16>, vector<8x32xf32> -> vector<8x32xf32>
    %c0_3 = arith.constant 0 : index
    %c0_4 = arith.constant 0 : index
    %3 = vector.load %arg3[%c0_3, %c0_4] : memref<8x32xbf16, #tpu.memory_space<vmem>>, vector<8x32xbf16>
    %c0_5 = arith.constant 0 : index
    %c0_6 = arith.constant 0 : index
    %4 = vector.load %arg5[%c0_5, %c0_6] : memref<32x32xbf16, #tpu.memory_space<vmem>>, vector<32x32xbf16>
    %cst_7 = arith.constant dense<0.000000e+00> : vector<8x32xf32>
    %5 = tpu.matmul %3, %4, %cst_7 {dimension_numbers = #tpu.dot_dimension_numbers<[1], [0], [0], [1], [0, 0, 1, 1], [], []>} : vector<8x32xbf16>, vector<32x32xbf16>, vector<8x32xf32> -> vector<8x32xf32>
    %6 = arith.addf %2, %5 : vector<8x32xf32>
    %c0_8 = arith.constant 0 : index
    %c0_9 = arith.constant 0 : index
    %7 = vector.load %arg6[%c0_8, %c0_9] : memref<1x32xf32, #tpu.memory_space<vmem>>, vector<1x32xf32>
    %8 = vector.broadcast %7 : vector<1x32xf32> to vector<8x32xf32>
    %9 = arith.addf %6, %8 : vector<8x32xf32>
    %c0_10 = arith.constant 0 : index
    %10 = memref.load %arg1[%c0_10] : memref<3xf32, #tpu.memory_space<smem>>
    %cst_11 = arith.constant 0.000000e+00 : f32
    %11 = vector.broadcast %cst_11 : f32 to vector<8x32xf32>
    %12 = arith.cmpf oge, %9, %11 : vector<8x32xf32>
    %13 = vector.broadcast %10 : f32 to vector<8x32xf32>
    %14 = arith.mulf %13, %9 : vector<8x32xf32>
    %15 = arith.select %12, %9, %14 : vector<8x32xi1>, vector<8x32xf32>
    %16 = arith.truncf %15 : vector<8x32xf32> to vector<8x32xbf16>
    %c0_12 = arith.constant 0 : index
    %c0_13 = arith.constant 0 : index
    %17 = vector.load %arg7[%c0_12, %c0_13] : memref<32x32xbf16, #tpu.memory_space<vmem>>, vector<32x32xbf16>
    %cst_14 = arith.constant dense<0.000000e+00> : vector<8x32xf32>
    %18 = tpu.matmul %16, %17, %cst_14 {dimension_numbers = #tpu.dot_dimension_numbers<[1], [0], [0], [1], [0, 0, 1, 1], [], []>} : vector<8x32xbf16>, vector<32x32xbf16>, vector<8x32xf32> -> vector<8x32xf32>
    %c0_15 = arith.constant 0 : index
    %c0_16 = arith.constant 0 : index
    %19 = vector.load %arg8[%c0_15, %c0_16] : memref<1x32xf32, #tpu.memory_space<vmem>>, vector<1x32xf32>
    %20 = vector.broadcast %19 : vector<1x32xf32> to vector<8x32xf32>
    %21 = arith.addf %18, %20 : vector<8x32xf32>
    %c1 = arith.constant 1 : index
    %22 = memref.load %arg1[%c1] : memref<3xf32, #tpu.memory_space<smem>>
    %cst_17 = arith.constant 0.000000e+00 : f32
    %23 = vector.broadcast %cst_17 : f32 to vector<8x32xf32>
    %24 = arith.cmpf oge, %21, %23 : vector<8x32xf32>
    %25 = vector.broadcast %22 : f32 to vector<8x32xf32>
    %26 = arith.mulf %25, %21 : vector<8x32xf32>
    %27 = arith.select %24, %21, %26 : vector<8x32xi1>, vector<8x32xf32>
    %28 = arith.truncf %27 : vector<8x32xf32> to vector<8x32xbf16>
    %c0_18 = arith.constant 0 : index
    %c0_19 = arith.constant 0 : index
    %29 = vector.load %arg9[%c0_18, %c0_19] : memref<32x16xbf16, #tpu.memory_space<vmem>>, vector<32x16xbf16>
    %cst_20 = arith.constant dense<0.000000e+00> : vector<8x16xf32>
    %30 = tpu.matmul %28, %29, %cst_20 {dimension_numbers = #tpu.dot_dimension_numbers<[1], [0], [0], [1], [0, 0, 1, 1], [], []>} : vector<8x32xbf16>, vector<32x16xbf16>, vector<8x16xf32> -> vector<8x16xf32>
    %c0_21 = arith.constant 0 : index
    %c0_22 = arith.constant 0 : index
    %31 = vector.load %arg10[%c0_21, %c0_22] : memref<1x16xf32, #tpu.memory_space<vmem>>, vector<1x16xf32>
    %32 = vector.broadcast %31 : vector<1x16xf32> to vector<8x16xf32>
    %33 = arith.addf %30, %32 : vector<8x16xf32>
    %c2 = arith.constant 2 : index
    %34 = memref.load %arg1[%c2] : memref<3xf32, #tpu.memory_space<smem>>
    %cst_23 = arith.constant 0.000000e+00 : f32
    %35 = vector.broadcast %cst_23 : f32 to vector<8x16xf32>
    %36 = arith.cmpf oge, %33, %35 : vector<8x16xf32>
    %37 = vector.broadcast %34 : f32 to vector<8x16xf32>
    %38 = arith.mulf %37, %33 : vector<8x16xf32>
    %39 = arith.select %36, %33, %38 : vector<8x16xi1>, vector<8x16xf32>
    %40 = arith.truncf %39 : vector<8x16xf32> to vector<8x16xbf16>
    %c0_24 = arith.constant 0 : index
    %c0_25 = arith.constant 0 : index
    %41 = vector.load %arg11[%c0_24, %c0_25] : memref<16x2xbf16, #tpu.memory_space<vmem>>, vector<16x2xbf16>
    %cst_26 = arith.constant dense<0.000000e+00> : vector<8x2xf32>
    %42 = tpu.matmul %40, %41, %cst_26 {dimension_numbers = #tpu.dot_dimension_numbers<[1], [0], [0], [1], [0, 0, 1, 1], [], []>} : vector<8x16xbf16>, vector<16x2xbf16>, vector<8x2xf32> -> vector<8x2xf32>
    %c0_27 = arith.constant 0 : index
    %c0_28 = arith.constant 0 : index
    %43 = vector.load %arg12[%c0_27, %c0_28] : memref<1x2xf32, #tpu.memory_space<vmem>>, vector<1x2xf32>
    %44 = vector.broadcast %43 : vector<1x2xf32> to vector<8x2xf32>
    %45 = arith.addf %42, %44 : vector<8x2xf32>
    %c0_29 = arith.constant 0 : index
    %c0_30 = arith.constant 0 : index
    %46 = vector.load %arg13[%c0_29, %c0_30] : memref<8x2xf32, #tpu.memory_space<vmem>>, vector<8x2xf32>
    tpu.vector_store %arg13[%c0_29, %c0_30], %45 {strides = array<i32>} : memref<8x2xf32, #tpu.memory_space<vmem>>, vector<8x2xf32>,
    return
  }
  func.func @transform_0(%arg0: i32) -> i32 {
    %c0_i32 = arith.constant 0 : i32
    %c0_i32_0 = arith.constant 0 : i32
    return %c0_i32 : i32
  }
  func.func @transform_1(%arg0: i32) -> (i32, i32) {
    %c0_i32 = arith.constant 0 : i32
    %c0_i32_0 = arith.constant 0 : i32
    return %arg0, %c0_i32 : i32, i32
  }
  func.func @transform_2(%arg0: i32) -> (i32, i32) {
    %c0_i32 = arith.constant 0 : i32
    %c0_i32_0 = arith.constant 0 : i32
    return %arg0, %c0_i32 : i32, i32
  }
  func.func @transform_3(%arg0: i32) -> (i32, i32) {
    %c0_i32 = arith.constant 0 : i32
    %c0_i32_0 = arith.constant 0 : i32
    %c0_i32_1 = arith.constant 0 : i32
    return %c0_i32, %c0_i32_0 : i32, i32
  }
  func.func @transform_4(%arg0: i32) -> (i32, i32) {
    %c0_i32 = arith.constant 0 : i32
    %c0_i32_0 = arith.constant 0 : i32
    %c0_i32_1 = arith.constant 0 : i32
    return %c0_i32, %c0_i32_0 : i32, i32
  }
  func.func @transform_5(%arg0: i32) -> (i32, i32) {
    %c0_i32 = arith.constant 0 : i32
    %c0_i32_0 = arith.constant 0 : i32
    %c0_i32_1 = arith.constant 0 : i32
    return %c0_i32, %c0_i32_0 : i32, i32
  }
  func.func @transform_6(%arg0: i32) -> (i32, i32) {
    %c0_i32 = arith.constant 0 : i32
    %c0_i32_0 = arith.constant 0 : i32
    %c0_i32_1 = arith.constant 0 : i32
    return %c0_i32, %c0_i32_0 : i32, i32
  }
  func.func @transform_7(%arg0: i32) -> (i32, i32) {
    %c0_i32 = arith.constant 0 : i32
    %c0_i32_0 = arith.constant 0 : i32
    %c0_i32_1 = arith.constant 0 : i32
    return %c0_i32, %c0_i32_0 : i32, i32
  }
  func.func @transform_8(%arg0: i32) -> (i32, i32) {
    %c0_i32 = arith.constant 0 : i32
    %c0_i32_0 = arith.constant 0 : i32
    %c0_i32_1 = arith.constant 0 : i32
    return %c0_i32, %c0_i32_0 : i32, i32
  }
  func.func @transform_9(%arg0: i32) -> (i32, i32) {
    %c0_i32 = arith.constant 0 : i32
    %c0_i32_0 = arith.constant 0 : i32
    %c0_i32_1 = arith.constant 0 : i32
    return %c0_i32, %c0_i32_0 : i32, i32
  }
  func.func @transform_10(%arg0: i32) -> (i32, i32) {
    %c0_i32 = arith.constant 0 : i32
    %c0_i32_0 = arith.constant 0 : i32
    %c0_i32_1 = arith.constant 0 : i32
    return %c0_i32, %c0_i32_0 : i32, i32
  }
  func.func @transform_11(%arg0: i32) -> (i32, i32) {
    %c0_i32 = arith.constant 0 : i32
    %c0_i32_0 = arith.constant 0 : i32
    %c0_i32_1 = arith.constant 0 : i32
    return %c0_i32, %c0_i32_0 : i32, i32
  }
  func.func @transform_12(%arg0: i32) -> (i32, i32) {
    %c0_i32 = arith.constant 0 : i32
    %c0_i32_0 = arith.constant 0 : i32
    return %arg0, %c0_i32 : i32, i32
  }
}

</mosaic_0001>

<bundles_post_ra>
// kernel: context_mlp_forward.1
= control target key start
LH: loop header
LB: loop body
LE: loop exit
PB: predicated region body
PF: predicated region fallthrough
CT: control target
= control target key end

     0   :  { %17 = vsyncpa [#allocation3], 0  ;;  %s626_s0 = inlined_call_operand.vmem [shape: f32[3], index: 0, kind: input, shape index: {}]   ;;  %s627_s1 = inlined_call_operand.vmem [shape: bf16[8,32], index: 1, kind: input, shape index: {}]   ;;  %s628_s2 = inlined_call_operand.vmem [shape: bf16[8,32], index: 2, kind: input, shape index: {}]   ;;  %s629_s3 = inlined_call_operand.vmem [shape: bf16[32,32], index: 3, kind: input, shape index: {}]   ;;  %s630_s4 = inlined_call_operand.vmem [shape: bf16[32,32], index: 4, kind: input, shape index: {}]   ;;  %s631_s5 = inlined_call_operand.vmem [shape: f32[1,32], index: 5, kind: input, shape index: {}]   ;;  %s632_s6 = inlined_call_operand.vmem [shape: bf16[32,32], index: 6, kind: input, shape index: {}]   ;;  %s633_s7 = inlined_call_operand.vmem [shape: f32[1,32], index: 7, kind: input, shape index: {}]   ;;  %s634_s8 = inlined_call_operand.vmem [shape: bf16[32,16], index: 8, kind: input, shape index: {}]   ;;  %s635_s9 = inlined_call_operand.vmem [shape: f32[1,16], index: 9, kind: input, shape index: {}]   ;;  %s636_s10 = inlined_call_operand.vmem [shape: bf16[16,2], index: 10, kind: input, shape index: {}]   ;;  %s637_s11 = inlined_call_operand.vmem [shape: f32[1,2], index: 11, kind: input, shape index: {}]   ;;  %s638_s12 = inlined_call_operand.vmem [shape: f32[8,2], index: 12, kind: output, shape index: {}]  }
   0x1   :  { %s24_s23 = sshll.u32 %s626_s0, 4  ;;  %s25_s23 = int_to_ptr.vmem [resolvable:$true] %s24_s23 }
   0x2   :  { %s484_s24 = scalar_lea.vmem %s25_s23, 16  ;;  %p489_p1 = scmp.lt.s32.totalorder %s25_s23, %s25_s23 }
   0x3   :  { %p485_p0 = scmp.ne.s32.totalorder %s25_s23, %s484_s24  ;;  %p490_p2 = scmp.lt.s32.totalorder %s484_s24, %s484_s24 }
   0x5   :  { %p491_p3 = por %p490_p2, %p489_p1 }
   0x7   :  { %p492_p4 = pnand %p491_p3, %p485_p0 }
   0x9   :  { %495 = shalt.err (!%p492_p4)
}
   0xa   :  { %s498_s25 = smov [#allocation2]  }
   0xb   :  { %27 = dma.vmem_to_smem %s25_s23, 16, %s498_s25, [#allocation3]  }
   0xc   :  { %496 = dma.done.wait [#allocation3], 16  }
   0xd   :  { %497 = vsyncadd [#allocation3], 4294967280 }
   0xe   :  { %53 = sfence }
   0xf   :  { %v475_v0 = vld [vmem:[%s630_s4] sm:$0xff]   ;;  %v499_v1 = vmov 0.0   ;;  %v477_v3 = vld [vmem:[%s630_s4 + $0x8] sm:$0xff]   ;;  %vm500_vm0 = vmmov 0   ;;  %vm77_vm1 = vcmask 261120   ;;  %s184_s19 = sld [smem:[#allocation2]] }
  0x10   :  { %434 = vmatprep.subr.bf16.mxu0 %v499_v1  ;;  %442 = vmatprep.subr.bf16.mxu1 %v499_v1  ;;  %v476_v2 = vld [vmem:[%s629_s3] sm:$0xff]   ;;  %v478_v4 = vld [vmem:[%s629_s3 + $0x8] sm:$0xff]   ;;  %s411_s24 = sld [smem:[#allocation2 + $0x1]]  ;;  %s416_s0 = sld [smem:[#allocation2 + $0x2]]  ;;  %vm349_vm5 = vcmask 130048   ;;  %vm393_vm6 = vcmask 15360  }
  0x11   :  { %435 = vmatpush3.bf16.msra.mxu0 %v475_v0  ;;  %438 = vmatprep.mubr.msk.bf16.mxu0 %vm500_vm0, %v499_v1  ;;  %v60_v5 = vld [vmem:[%s628_s2] sm:$0xf]  ;;  %v480_v8 = vld [vmem:[%s632_s6 + $0x8] sm:$0xff]  }
  0x12   :  { %443 = vmatpush3.bf16.msra.mxu1 %v476_v2  ;;  %436 = vmatprep.subr.bf16.mxu0 %v499_v1  ;;  %v55_v6 = vld [vmem:[%s627_s1] sm:$0xf]  ;;  %v482_v25 = vld [vmem:[%s634_s8 + $0x8] sm:$0xff]  }
  0x13   :  { %444 = vmatprep.subr.bf16.mxu1 %v499_v1  ;;  %446 = vmatprep.mubr.msk.bf16.mxu1 %vm500_vm0, %v499_v1  ;;  %v479_v7 = vld [vmem:[%s632_s6] sm:$0xff]  }
  0x14   :  { %v406_v11 = vld [vmem:[%s631_s5] ss:$0 sm:$0xff] }
  0x15   :  { %437 = vmatpush3.bf16.msra.mxu0 %v477_v3  ;;  %v186_v16 = vstv %s184_s19  ;;  %v481_v24 = vld [vmem:[%s634_s8] sm:$0xff]  }
  0x16   :  { %445 = vmatpush3.bf16.msra.mxu1 %v478_v4  ;;  %450 = vmatprep.subr.bf16.mxu0 %v499_v1  ;;  %v407_v26 = vld [vmem:[%s633_s7] ss:$0 sm:$0xff]  ;;  %v258_v28 = vstv %s411_s24  ;;  %v330_v39 = vstv %s416_s0 }
  0x17   :  { %458 = vmatprep.subr.bf16.mxu1 %v499_v1  ;;  %v483_v36 = vld [vmem:[%s636_s10] sm:$0xff]  }
  0x18   :  { %439 = vmatmul.mubr.msk.bf16.vlgmr.msra.gmra.mrb[0].mxu0 %vm77_vm1, %v60_v5  ;;  %v412_v37 = vld [vmem:[%s635_s9] ss:$0 sm:$0xff] }
  0x19   :  { %447 = vmatmul.mubr.msk.bf16.vlgmr.msra.gmra.mrb[0].mxu1 %vm77_vm1, %v55_v6  ;;  %454 = vmatprep.mubr.msk.bf16.mxu0 %vm500_vm0, %v499_v1  ;;  %v417_v47 = vld [vmem:[%s637_s11] ss:$0 sm:$0xff] }
  0x1a   :  { %462 = vmatprep.mubr.msk.bf16.mxu1 %vm500_vm0, %v499_v1  ;;  %451 = vmatpush3.bf16.msra.mxu0 %v479_v7 }
  0x1b   :  { %452 = vmatprep.subr.bf16.mxu0 %v499_v1  ;;  %459 = vmatpush3.bf16.msra.mxu1 %v481_v24 }
  0x1c   :  { %460 = vmatprep.subr.bf16.mxu1 %v499_v1 }
  0x1e   :  { %453 = vmatpush3.bf16.msra.mxu0 %v480_v8 }
  0x1f   :  { %466 = vmatprep.subr.bf16.mxu0 %v499_v1  ;;  %461 = vmatpush3.bf16.msra.mxu1 %v482_v25 }
  0xeb   :  { %v115_v9 = vpop.f32.mrb[0].mxu0 }
  0xec   :  { %v170_v10 = vpop.f32.mrb[0].mxu1  ;;  %v440_v12 = vpop.f32.mrb[1].mxu0 }
  0xed   :  { %v171_v13 = vadd.f32 %v170_v10, %v115_v9  ;;  %v448_v14 = vpop.f32.mrb[1].mxu1  ;;  %v118_v15 = vpop.f32.mrb[2].mxu0 }
  0xee   :  { %v173_v17 = vpop.f32.mrb[2].mxu1  ;;  %v441_v18 = vpop.f32.mrb[3].mxu0 }
  0xef   :  { %v183_v19 = vadd.f32 %v406_v11, %v171_v13  ;;  %v449_v20 = vpop.f32.mrb[3].mxu1 }
  0xf1   :  { %vm185_vm2 = vcmp.ge.f32.partialorder %v183_v19, 0.0  ;;  %v187_v21 = vmul.f32 %v186_v16, %v183_v19 }
  0xf3   :  { %v188_v22 = vsel %vm185_vm2, %v183_v19, %v187_v21 }
  0xf4   :  { %v189_v23 = vpack.c.bf16 %v188_v22, %v188_v22 }
  0xf6   :  { %455 = vmatmul.mubr.msk.bf16.vlgmr.msra.gmra.mrb[4].mxu0 %vm77_vm1, %v189_v23 }
  0xf7   :  { %468 = vmatprep.mubr.msk.bf16.mxu0 %vm500_vm0, %v499_v1  ;;  %467 = vmatpush3.bf16.msra.mxu0 %v483_v36 }
 0x1c9   :  { %v250_v27 = vpop.f32.mrb[4].mxu0 }
 0x1ca   :  { %v251_v29 = vadd.f32 %v407_v26, %v250_v27  ;;  %v456_v30 = vpop.f32.mrb[5].mxu0 }
 0x1cb   :  { %v253_v31 = vpop.f32.mrb[6].mxu0 }
 0x1cc   :  { %vm257_vm3 = vcmp.ge.f32.partialorder %v251_v29, 0.0  ;;  %v259_v32 = vmul.f32 %v258_v28, %v251_v29  ;;  %v457_v33 = vpop.f32.mrb[7].mxu0 }
 0x1ce   :  { %v260_v34 = vsel %vm257_vm3, %v251_v29, %v259_v32 }
 0x1cf   :  { %v261_v35 = vpack.c.bf16 %v260_v34, %v260_v34 }
 0x1d1   :  { %463 = vmatmul.mubr.msk.bf16.vlgmr.msra.gmra.mrb[4].mxu1 %vm77_vm1, %v261_v35 }
 0x2a4   :  { %v322_v38 = vpop.f32.mrb[4].mxu1 }
 0x2a5   :  { %v323_v40 = vadd.f32 %v412_v37, %v322_v38  ;;  %v464_v41 = vpop.f32.mrb[5].mxu1 }
 0x2a6   :  { %v325_v42 = vpop.f32.mrb[6].mxu1 }
 0x2a7   :  { %vm329_vm4 = vcmp.ge.f32.partialorder %v323_v40, 0.0  ;;  %v331_v43 = vmul.f32 %v330_v39, %v323_v40  ;;  %v465_v44 = vpop.f32.mrb[7].mxu1 }
 0x2a9   :  { %v332_v45 = vsel %vm329_vm4, %v323_v40, %v331_v43 }
 0x2aa   :  { %v333_v46 = vpack.c.bf16 %v332_v45, %v332_v45 }
 0x2ac   :  { %469 = vmatmul.mubr.msk.bf16.vlgmr.msra.gmra.mrb[8].mxu0 %vm349_vm5, %v333_v46 }
 0x37f   :  { %v387_v48 = vpop.f32.mrb[8].mxu0 }
 0x380   :  { %v388_v49 = vadd.f32 %v417_v47, %v387_v48  ;;  %v470_v50 = vpop.f32.mrb[9].mxu0 }
 0x381   :  { %v390_v51 = vpop.f32.mrb[10].mxu0 }
 0x382   :  { %394 = vst.msk [vmem:[%s638_s12] sm:$0xff] %vm393_vm6, %v388_v49  ;;  %v471_v52 = vpop.f32.mrb[11].mxu0 }
 0x383   :  { %399 = vsyncpa [#allocation3], 1 }

</bundles_post_ra>
